<compile_context>
chip_gen: v6e
topology: v6e:2x2x1
jax: 0.10.0
libtpu: 0.0.40
codegen_flags: <defaults>
</compile_context>

<pallas_src>
import math
import functools

import jax
import jax.numpy as jnp
from jax.experimental import pallas as pl
from jax.experimental.pallas import tpu as pltpu


def _cdiv(a, b):
    return -(-a // b)


# -----------------------------------------------------------------------------
# Parameter setup (mirrors PositionalEncoding.__init__, done once in plain JAX)
# -----------------------------------------------------------------------------
def make_pe_table(max_len: int, d_model: int) -> jnp.ndarray:
    """pe of shape (max_len, d_model), same formula as the PyTorch buffer."""
    position = jnp.arange(0.0, max_len, dtype=jnp.float32)[:, None]           # (L, 1)
    div_term = jnp.exp(jnp.arange(0.0, d_model, 2, dtype=jnp.float32)
                       * (-(math.log(10000.0) / d_model)))                    # (D/2,)
    angles = position * div_term                                              # (L, D/2)
    pe = jnp.zeros((max_len, d_model), dtype=jnp.float32)
    pe = pe.at[:, 0::2].set(jnp.sin(angles))
    pe = pe.at[:, 1::2].set(jnp.cos(angles))
    return pe


# -----------------------------------------------------------------------------
# Generation-conditional VMEM budget / tile-size targets
# -----------------------------------------------------------------------------
def _vmem_budget_and_tile_bytes():
    """Returns (vmem_limit_bytes, target x-tile bytes) for the current TPU."""
    try:
        vmem_cap = int(pltpu.get_tpu_info().vmem_capacity_bytes)
    except Exception:
        vmem_cap = 64 * 1024 * 1024            # unknown: be conservative (v7x-like)
    if vmem_cap >= 96 * 1024 * 1024:
        # v5e / v6e: 128 MiB physical VMEM -> raise scoped limit, bigger tiles.
        return 64 * 1024 * 1024, 6 * 1024 * 1024
    # v7x: 64 MiB per TensorCore -> keep ~2 MiB x tiles, 32 MiB scoped limit.
    return 32 * 1024 * 1024, 2 * 1024 * 1024


# -----------------------------------------------------------------------------
# Dropout helpers
# -----------------------------------------------------------------------------
def _keep_threshold_u32(p):
    # P(bits < threshold) ~= p  =>  keep (bits >= threshold) with prob 1 - p.
    return jnp.uint32(min(int(round(p * 2.0 ** 32)), 2 ** 32 - 1))


def _cheap_hash_u32(x):
    # One cheap multiply-xorshift mixing round (fallback PRNG only; the hardware
    # PRNG is used on real TPUs, so this never sits on the critical VALU slot there).
    x = x * jnp.uint32(0x7FEB352D)
    x = x ^ (x >> 16)
    x = x * jnp.uint32(0x846CA68B)
    return x


# -----------------------------------------------------------------------------
# Kernel A: lane-dense flattened (B, S*D) tiles -> blocks (bb, chunk)
# -----------------------------------------------------------------------------
def _pe_dropout_kernel_2d(seed_ref, x_ref, pe_ref, o_ref, *,
                          p, training, bb, chunk, row_stride, use_hw_prng):
    # x_ref: (bb, chunk) tile of the flattened (B, S*D) input
    # pe_ref: (1, chunk) matching tile of the flattened PE row (broadcast over batch)
    y = x_ref[...].astype(jnp.float32) + pe_ref[...].astype(jnp.float32)

    if training and p >= 1.0:
        y = jnp.zeros_like(y)
    elif training and p > 0.0:
        shape = y.shape
        if use_hw_prng:
            # Hardware PRNG: reseed per grid step from (seed, flat step id) so the
            # result is deterministic and safe with dimension_semantics="parallel".
            step = pl.program_id(0) * pl.num_programs(1) + pl.program_id(1)
            pltpu.prng_seed(seed_ref[0] + step * 7919)
            bits = pltpu.prng_random_bits(shape)
            if bits.dtype != jnp.uint32:
                bits = pltpu.bitcast(bits, jnp.uint32)
        else:
            # Stateless fallback (interpret / non-TPU backends): hash of a globally
            # unique counter; scalar offsets are folded before any vector op.
            base = (seed_ref[0].astype(jnp.uint32) * jnp.uint32(0x9E3779B9)
                    + pl.program_id(0).astype(jnp.uint32)
                    * jnp.uint32((bb * row_stride) & 0xFFFFFFFF)
                    + pl.program_id(1).astype(jnp.uint32) * jnp.uint32(chunk))
            row_off = (jax.lax.broadcasted_iota(jnp.int32, (shape[0], 1), 0)
                       .astype(jnp.uint32) * jnp.uint32(row_stride & 0xFFFFFFFF))
            col = jax.lax.broadcasted_iota(jnp.int32, shape, 1).astype(jnp.uint32)
            bits = _cheap_hash_u32(col + row_off + base)
        keep = bits >= _keep_threshold_u32(p)
        y = jnp.where(keep, y * jnp.float32(1.0 / (1.0 - p)), jnp.float32(0.0))

    o_ref[...] = y.astype(o_ref.dtype)


# -----------------------------------------------------------------------------
# Kernel B: un-flattened (B, TS, D) tiles for small batch with D % 128 == 0
# -----------------------------------------------------------------------------
def _pe_dropout_kernel_3d(seed_ref, x_ref, pe_ref, o_ref, *,
                          p, training, ts, d, seq_len, use_hw_prng):
    # x_ref: (B, ts, D) tile; pe_ref: (ts, D) tile, broadcast over the batch dim.
    y = x_ref[...].astype(jnp.float32) + pe_ref[...].astype(jnp.float32)

    if training and p >= 1.0:
        y = jnp.zeros_like(y)
    elif training and p > 0.0:
        shape = y.shape
        if use_hw_prng:
            pltpu.prng_seed(seed_ref[0] + pl.program_id(0) * 7919)
            bits = pltpu.prng_random_bits((shape[0] * shape[1], shape[2]))
            if bits.dtype != jnp.uint32:
                bits = pltpu.bitcast(bits, jnp.uint32)
            bits = bits.reshape(shape)
        else:
            base = (seed_ref[0].astype(jnp.uint32) * jnp.uint32(0x9E3779B9)
                    + pl.program_id(0).astype(jnp.uint32)
                    * jnp.uint32((ts * d) & 0xFFFFFFFF))
            b_off = (jax.lax.broadcasted_iota(jnp.int32, (shape[0], 1, 1), 0)
                     .astype(jnp.uint32) * jnp.uint32((seq_len * d) & 0xFFFFFFFF))
            s_off = (jax.lax.broadcasted_iota(jnp.int32, (1, shape[1], 1), 1)
                     .astype(jnp.uint32) * jnp.uint32(d & 0xFFFFFFFF))
            col = jax.lax.broadcasted_iota(jnp.int32, shape, 2).astype(jnp.uint32)
            bits = _cheap_hash_u32(col + s_off + b_off + base)
        keep = bits >= _keep_threshold_u32(p)
        y = jnp.where(keep, y * jnp.float32(1.0 / (1.0 - p)), jnp.float32(0.0))

    o_ref[...] = y.astype(o_ref.dtype)


# -----------------------------------------------------------------------------
# Wrapper: dropout(x + pe[:S]) with generation-aware tiling
# -----------------------------------------------------------------------------
def positional_encoding_forward(x, pe_table, *, p=0.1, training=False, seed=0,
                                use_hw_prng=None):
    """x: (B, S, D). Returns dropout(x + pe[:S]) with the same dtype as x."""
    B, S, D = x.shape
    assert pe_table.shape[0] >= S and pe_table.shape[1] == D

    if use_hw_prng is None:
        use_hw_prng = (jax.default_backend() == "tpu")

    vmem_limit, target_tile_bytes = _vmem_budget_and_tile_bytes()
    budget = (vmem_limit * 3) // 4                      # headroom for internals
    x_bytes = jnp.dtype(x.dtype).itemsize
    pe_dtype = x.dtype
    pe_bytes = jnp.dtype(pe_dtype).itemsize

    seed_arr = jnp.asarray([seed], dtype=jnp.int32)
    sublane = 16 if x.dtype == jnp.bfloat16 else 8
    use_3d = (D % 128 == 0) and (B < sublane)

    if use_3d:
        # ---- (B, TS, D) blocks: full sublane occupancy for small batch ----
        pe2 = pe_table[:S, :].astype(pe_dtype)                      # (S, D)
        x_row = B * D * x_bytes                                     # x bytes / seq pos
        pe_row = D * pe_bytes
        per_ts = 4 * x_row + 2 * pe_row                             # 2x in + 2x out + 2x pe
        max_ts = max(8, ((budget // per_ts) // 8) * 8)
        tgt_ts = max(8, ((target_tile_bytes // max(x_row, 1)) // 8) * 8)
        ts_cap = min(max_ts, tgt_ts)
        n_steps = max(1, _cdiv(S, ts_cap))
        if n_steps < 2 and S >= 16:
            n_steps = 2                                             # >=2 steps (v7x megacore)
        ts = min(((_cdiv(S, n_steps) + 7) // 8) * 8, ts_cap)
        if ts >= S:
            ts = S                                                  # full-extent block is legal
        grid = (_cdiv(S, ts),)

        kernel = functools.partial(_pe_dropout_kernel_3d, p=float(p),
                                   training=bool(training), ts=ts, d=D,
                                   seq_len=S, use_hw_prng=bool(use_hw_prng))
        return pl.pallas_call(
            kernel,
            out_shape=jax.ShapeDtypeStruct((B, S, D), x.dtype),
            grid_spec=pltpu.PrefetchScalarGridSpec(
                num_scalar_prefetch=1,                              # seed -> SMEM
                grid=grid,
                in_specs=[
                    pl.BlockSpec((B, ts, D), lambda si, seed: (0, si, 0)),
                    pl.BlockSpec((ts, D),    lambda si, seed: (si, 0)),
                ],
                out_specs=pl.BlockSpec((B, ts, D), lambda si, seed: (0, si, 0)),
            ),
            compiler_params=pltpu.CompilerParams(
                dimension_semantics=("parallel",),
                vmem_limit_bytes=vmem_limit,
            ),
        )(seed_arr, x, pe2)

    # ---- lane-dense flattened (B, S*D) path ----
    N = S * D
    x2 = x.reshape(B, N)
    pe2 = pe_table[:S, :].reshape(1, N).astype(pe_dtype)

    def per_col(rows):
        return 4 * rows * x_bytes + 2 * pe_bytes        # pipeline bytes per column

    # Batch (sublane) tiling fallback so even huge B fits the VMEM budget.
    bb = B
    while bb > 8 and per_col(bb) * 128 > budget:
        bb = _cdiv(bb, 2)
    if bb < B:
        bb = max(8, (bb // 8) * 8)                      # sublane-aligned B blocks

    # Column (lane) tiling: target per-generation tile size, >=2 grid steps.
    max_cols = max(128, ((budget // per_col(bb)) // 128) * 128)
    tgt_cols = max(128, ((target_tile_bytes // max(bb * x_bytes, 1)) // 128) * 128)
    col_cap = min(max_cols, tgt_cols)

    if N <= 128:
        chunk = N                                       # full row (== dim, lane rule ok)
    else:
        n128 = _cdiv(N, 128)
        n_steps = max(1, _cdiv(n128, col_cap // 128))
        if n_steps < 2 and n128 >= 2 and _cdiv(B, bb) < 2:
            n_steps = 2                                 # >=2 steps (v7x megacore + pipelining)
        chunk = _cdiv(n128, n_steps) * 128

    grid = (_cdiv(B, bb), _cdiv(N, chunk))

    kernel = functools.partial(_pe_dropout_kernel_2d, p=float(p),
                               training=bool(training), bb=bb, chunk=chunk,
                               row_stride=N, use_hw_prng=bool(use_hw_prng))
    out2 = pl.pallas_call(
        kernel,
        out_shape=jax.ShapeDtypeStruct((B, N), x.dtype),
        grid_spec=pltpu.PrefetchScalarGridSpec(
            num_scalar_prefetch=1,                                  # seed -> SMEM
            grid=grid,
            in_specs=[
                pl.BlockSpec((bb, chunk), lambda bi, ci, seed: (bi, ci)),   # x tile
                pl.BlockSpec((1, chunk),  lambda bi, ci, seed: (0, ci)),    # pe tile
            ],
            out_specs=pl.BlockSpec((bb, chunk), lambda bi, ci, seed: (bi, ci)),
        ),
        compiler_params=pltpu.CompilerParams(
            dimension_semantics=("parallel", "parallel"),
            vmem_limit_bytes=vmem_limit,
        ),
    )(seed_arr, x2, pe2)

    return out2.reshape(B, S, D)


# -----------------------------------------------------------------------------
# Demo / smoke test
# -----------------------------------------------------------------------------
if __name__ == "__main__":
    MAX_LEN = 64
    P = 0.1

    # --- shape exercising the lane-dense flattened path (D not lane-aligned) ---
    B, S, D = 2, 8, 32
    key = jax.random.PRNGKey(0)
    x = jax.random.normal(key, (B, S, D), dtype=jnp.float32)
    pe_table = make_pe_table(MAX_LEN, D)
    ref = x + pe_table[:S][None, :, :]

    out_eval = jax.block_until_ready(
        positional_encoding_forward(x, pe_table, p=P, training=False))
    assert out_eval.shape == (B, S, D)
    assert jnp.allclose(out_eval, ref, atol=1e-6), "eval-mode mismatch (2D path)"

    out_train = jax.block_until_ready(
        positional_encoding_forward(x, pe_table, p=P, training=True, seed=1234))
    scaled = ref * (1.0 / (1.0 - P))
    ok = (out_train == 0) | (jnp.abs(out_train - scaled) <= 1e-5 + 1e-5 * jnp.abs(scaled))
    assert bool(jnp.all(ok)), "training values must be 0 or ref/(1-p) (2D path)"

    # --- shape exercising the (B, TS, D) small-batch, lane-aligned path ---
    D2 = 128
    x2 = jax.random.normal(jax.random.PRNGKey(1), (B, S, D2), dtype=jnp.float32)
    pe_table2 = make_pe_table(MAX_LEN, D2)
    ref2 = x2 + pe_table2[:S][None, :, :]

    out2_eval = jax.block_until_ready(
        positional_encoding_forward(x2, pe_table2, p=P, training=False))
    assert jnp.allclose(out2_eval, ref2, atol=1e-6), "eval-mode mismatch (3D path)"

    out2_train = jax.block_until_ready(
        positional_encoding_forward(x2, pe_table2, p=P, training=True, seed=7))
    scaled2 = ref2 * (1.0 / (1.0 - P))
    ok2 = (out2_train == 0) | (jnp.abs(out2_train - scaled2)
                               <= 1e-5 + 1e-5 * jnp.abs(scaled2))
    assert bool(jnp.all(ok2)), "training values must be 0 or ref/(1-p) (3D path)"

    print("KERNEL_OK")
</pallas_src>

<mosaic_0001>
module attributes {stable_mosaic.version = 11 : i64} {
  func.func @_pe_dropout_kernel_2d(%arg0: i32, %arg1: i32, %arg2: memref<1xi32, #tpu.memory_space<smem>>, %arg3: memref<2x128xf32, #tpu.memory_space<vmem>>, %arg4: memref<1x128xf32, #tpu.memory_space<vmem>>, %arg5: memref<2x128xf32, #tpu.memory_space<vmem>>) attributes {dimension_semantics = [#tpu.dimension_semantics<parallel>, #tpu.dimension_semantics<parallel>], iteration_bounds = array<i64: 1, 2>, scalar_prefetch = 1 : i64, scratch_operands = 0 : i64, tpu.core_type = #tpu.core_type<tc>, window_params = [{transform_indices = @transform_0, window_bounds = array<i64: 2, 128>}, {transform_indices = @transform_1, window_bounds = array<i64: 1, 128>}, {transform_indices = @transform_2, window_bounds = array<i64: 2, 128>}]} {
    %c0 = arith.constant 0 : index
    %c0_0 = arith.constant 0 : index
    %0 = vector.load %arg3[%c0, %c0_0] : memref<2x128xf32, #tpu.memory_space<vmem>>, vector<2x128xf32>
    %c0_1 = arith.constant 0 : index
    %c0_2 = arith.constant 0 : index
    %1 = vector.load %arg4[%c0_1, %c0_2] : memref<1x128xf32, #tpu.memory_space<vmem>>, vector<1x128xf32>
    %2 = vector.broadcast %1 : vector<1x128xf32> to vector<2x128xf32>
    %3 = arith.addf %0, %2 : vector<2x128xf32>
    %c0_3 = arith.constant 0 : index
    %c0_4 = arith.constant 0 : index
    %4 = vector.load %arg5[%c0_3, %c0_4] : memref<2x128xf32, #tpu.memory_space<vmem>>, vector<2x128xf32>
    tpu.vector_store %arg5[%c0_3, %c0_4], %3 {strides = array<i32>} : memref<2x128xf32, #tpu.memory_space<vmem>>, vector<2x128xf32>,
    return
  }
  func.func @transform_0(%arg0: i32, %arg1: i32, %arg2: memref<1xi32, #tpu.memory_space<smem>>) -> (i32, i32) {
    %c0_i32 = arith.constant 0 : i32
    return %arg0, %arg1 : i32, i32
  }
  func.func @transform_1(%arg0: i32, %arg1: i32, %arg2: memref<1xi32, #tpu.memory_space<smem>>) -> (i32, i32) {
    %c0_i32 = arith.constant 0 : i32
    %c0_i32_0 = arith.constant 0 : i32
    return %c0_i32, %arg1 : i32, i32
  }
  func.func @transform_2(%arg0: i32, %arg1: i32, %arg2: memref<1xi32, #tpu.memory_space<smem>>) -> (i32, i32) {
    %c0_i32 = arith.constant 0 : i32
    return %arg0, %arg1 : i32, i32
  }
}

</mosaic_0001>

<bundles_post_ra>
// kernel: tpu_custom_call.1
= control target key start
LH: loop header
LB: loop body
LE: loop exit
PB: predicated region body
PF: predicated region fallthrough
CT: control target
= control target key end

     0   :  { %9 = vsyncpa [#allocation5], 0  ;;  %s657_s0 = inlined_call_operand.<no memory space> [shape: s32[1], index: 0, kind: input, shape index: {}]   ;;  %s658_s1 = inlined_call_operand.hbm [shape: f32[2,256], index: 1, kind: input, shape index: {}]   ;;  %s659_s2 = inlined_call_operand.vmem [shape: f32[1,256], index: 2, kind: input, shape index: {}]   ;;  %s660_s3 = inlined_call_operand.hbm [shape: f32[2,256], index: 3, kind: output, shape index: {}]  }
   0x1   :  { %11 = vsyncpa [#allocation5 + $0x1], 0 }
   0x2   :  { %12 = vsyncpa [#allocation6], 0 }
   0x3   :  { %14 = vsyncpa [#allocation6 + $0x1], 0  ;;  %s518_s12 = smov 0   ;;  %s520_s13 = smov 0  }
   0x4   :  { %s522_s14 = smov 0   ;;  %s524_s0 = smov 0  }
   0x5   :  { %s526_s15 = smov 0   ;;  %s528_s16 = smov 0  }
   0x6 LB: > { %s310_s17 = sadd.s32 4294967295, %s494_s16   ;;  %s311_s18 = sadd.s32 4294967294, %s494_s16   ;;  %s494_s16 = sphi %s528_s16, %s20_s16   ;;  %s490_s15 = sphi %s526_s15, %s672_s15   ;;  %s486_s0 = sphi %s524_s0, %s671_s0   ;;  %s482_s14 = sphi %s522_s14, %s670_s14   ;;  %s478_s13 = sphi %s520_s13, %s669_s13   ;;  %s474_s12 = sphi %s518_s12, %s668_s12  }
   0x7   : > { %s29_s19 = sadd.s32 1, %s490_s15  ;;  %s41_s20 = sadd.s32 1, %s482_s14 }
   0x8   : > { %p30_p0 = scmp.ge.s32.totalorder %s29_s19, 2  ;;  %p48_p1 = scmp.ne.s32.totalorder %s482_s14, %s478_s13 }
   0x9   : > { %p49_p2 = scmp.eq.s32.totalorder %s494_s16, 0  ;;  %p54_p3 = scmp.ne.s32.totalorder %s478_s13, %s474_s12 }
   0xa   : > { %s674_s19 = smov (%p30_p0, %s29_s19), 0  ;;  %p55_p5 = scmp.eq.s32.totalorder %s310_s17, 0 }
   0xb   : > { %p559_p4 = por %p49_p2, %p48_p1  ;;  %s37_s22 = ssub.s32 %s490_s15, %s674_s19 }
   0xc   : > { %p106_p6 = scmp.eq.s32.totalorder %s310_s17, 1  ;;  %p39_p7 = scmp.eq.s32.totalorder %s37_s22, 0 }
   0xd   : > { %p565_p8 = por %p55_p5, %p54_p3  ;;  %p112_p10 = scmp.eq.s32.totalorder %s311_s18, 1 }
   0xe   : > { %p569_p9 = por %p106_p6, %p48_p1  ;;  %p336_p13 = scmp.lt.s32.totalorder %s494_s16, 2 }
   0xf   : > { %s574_s25 = scalar_select %p39_p7, %s482_s14, %s41_s20  }
  0x10   : > { %p576_p11 = por %p112_p10, %p54_p3  ;;  %s132_s27 = sand.u32 1, %s482_s14  }
  0x11   : > { %s314_s28 = sshll.u32 %s132_s27, 1  ;;  %s315_s29 = sshll.u32 %s490_s15, 5 }
  0x12   : > { %s664_s26 = scalar_select %p576_p11, 1, 0 }
  0x13   : > { %s143_s5 = scalar_lea.hbm %s658_s1, %s315_s29  ;;  %s136_s6 = scalar_lea.vmem [#allocation4], %s314_s28 }
  0x14   : > { %s145_s7 = sshll.u32 %s136_s6, 4  ;;  %p589_p0 = pnand %p336_p13, %p559_p4  ;;  %s146_s7 = int_to_ptr.vmem [resolvable:$true] %s145_s7 }
  0x15   : > { %p316_p1 = scmp.ge.s32.totalorder %s494_s16, 1  ;;  %p156_p2 = scmp.lt.s32.totalorder %s494_s16, 3 }
  0x16   : > { %s133_s9 = scalar_lea.sflag [#allocation5], %s132_s27  ;;  %p388_p3 = pneg %p589_p0 }
  0x17   : > { %s399_s10 = scalar_lea.vmem %s146_s7, 32  ;;  %s496_s11 = smov [#allocation4]  }
  0x18   : > { %p400_p5 = scmp.ne.s32.totalorder %s146_s7, %s399_s10  ;;  %s404_s17 = sshll.u32 %s496_s11, 4  ;;  %s405_s17 = int_to_ptr.vmem [resolvable:$false] %s404_s17 }
  0x19   : > { %s406_s18 = scalar_lea.vmem %s405_s17, 64  ;;  %p407_p10 = scmp.lt.s32.totalorder %s146_s7, %s405_s17 }
  0x1a   : > { %p402_p6 = pnand %p400_p5, %p388_p3  ;;  %p408_p12 = scmp.lt.s32.totalorder %s406_s18, %s399_s10 }
  0x1c   : > { %p403_p7 = pneg %p402_p6  ;;  %p409_p4 = por %p408_p12, %p407_p10 }
  0x1e   : > { %p410_p13 = pnand %p409_p4, %p403_p7 }
  0x20   : > { %413 = shalt.err (!%p410_p13)
}
  0x21   : > { %331 = dma.hbm_to_vmem [thread:$0]  (!%p589_p0), %s143_s5, 32, %s146_s7, %s133_s9  }
  0x22   : > { %p157_p11 = pnand %p316_p1, %p156_p2 }
  0x23   : > { %s604_s20 = sand.u32 (!%p157_p11), 1, %s478_s13  }
  0x24   : > { %160 = sbr.rel (%p157_p11) target bundleno = 68 (0x44), region = 28  ;;  %s317_s21 = sshll.u32 (!%p157_p11), %s604_s20, 1 }
  0x25   : > { %s163_s22 = scalar_lea.sflag (!%p157_p11), [#allocation5], %s604_s20  ;;  %s166_s27 = scalar_lea.vmem (!%p157_p11), [#allocation4], %s317_s21 }
  0x29   : > { %465 = dma.done.wait (%p565_p8), %s163_s22, 32  }
  0x2a   : > { %467 = vsyncadd (%p565_p8), %s163_s22, 4294967264  ;;  %p190_p11 = scmp.lt.s32.totalorder %s486_s0, 1  ;;  %s189_s5 = scalar_lea.vmem [#allocation7], %s317_s21  ;;  %v193_v0 = vld [vmem:[%s166_s27] sm:$0x3] }
  0x2b   : > { %s219_s6 = sshll.u32 %s189_s5, 4  ;;  %s321_s7 = sshll.u32 %s486_s0, 5  ;;  %s220_s6 = int_to_ptr.vmem [resolvable:$true] %s219_s6 }
  0x2c   : > { %s191_s28 = scalar_select %p190_p11, %s486_s0, 1 }
  0x2d   : > { %s217_s9 = scalar_lea.hbm %s660_s3, %s321_s7  ;;  %s204_s10 = scalar_lea.sflag [#allocation6], %s604_s20 }
  0x2e   : > { %s192_s4 = scalar_lea.vmem %s659_s2, %s191_s28  ;;  %s414_s11 = scalar_lea.vmem %s220_s6, 32 }
  0x2f   : > { %v319_v1 = vld [vmem:[%s192_s4] ss:$0 sm:$0xff]  ;;  %p415_p8 = scmp.ne.s32.totalorder %s220_s6, %s414_s11  ;;  %s497_s17 = smov [#allocation7]  }
  0x30   : > { %v201_v2 = vadd.f32 %v319_v1, %v193_v0  ;;  %s418_s18 = sshll.u32 %s497_s17, 4  ;;  %s419_s18 = int_to_ptr.vmem [resolvable:$false] %s418_s18 }
  0x31   : > { %p416_p12 = pnand %p415_p8, %p569_p9  ;;  %s420_s21 = scalar_lea.vmem %s419_s18, 64 }
  0x32   : > { %202 = vst [vmem:[%s189_s5] sm:$0x3] %v201_v2  ;;  %p421_p1 = scmp.lt.s32.totalorder %s220_s6, %s419_s18  ;;  %p422_p2 = scmp.lt.s32.totalorder %s420_s21, %s414_s11 }
  0x33   : > { %p417_p0 = pneg %p416_p12 }
  0x34   : > { %p423_p3 = por %p422_p2, %p421_p1 }
  0x36   : > { %p424_p5 = pnand %p423_p3, %p417_p0 }
  0x38   : > { %427 = shalt.err (!%p424_p5)
}
  0x39   : > { %s428_s0 = scalar_lea.hbm %s217_s9, 32  ;;  %s432_s27 = scalar_lea.hbm %s660_s3, 64 }
  0x3a   : > { %p429_p6 = scmp.ne.s32.totalorder %s217_s9, %s428_s0  ;;  %p433_p4 = scmp.lt.s32.totalorder %s217_s9, %s660_s3 }
  0x3b   : > { %p434_p13 = scmp.lt.s32.totalorder %s432_s27, %s428_s0 }
  0x3c   : > { %p430_p7 = pnand %p429_p6, %p569_p9 }
  0x3d   : > { %p435_p11 = por %p434_p13, %p433_p4 }
  0x3e   : > { %p431_p10 = pneg %p430_p7 }
  0x40   : > { %p436_p8 = pnand %p435_p11, %p431_p10 }
  0x42   : > { %439 = shalt.err (!%p436_p8)
}
  0x43   : > { %326 = dma.vmem_to_hbm [thread:$0]  (%p569_p9), %s220_s6, 32, %s217_s9, %s204_s10  }
  0x44 PF: > { %s231_s30 = sand.u32 1, %s474_s12   ;;  %p666_p12 = scmp.ne.s32.totalorder %s664_s26, 0 }
  0x45   : > { %p667_p0 = scmp.ge.s32.totalorder %s494_s16, 2  ;;  %s232_s4 = scalar_lea.sflag [#allocation6], %s231_s30 }
  0x47   : > { %p333_p1 = pnand %p667_p0, %p666_p12 }
  0x49   : > { %p334_p2 = pneg %p333_p1 }
  0x4b   : > { %469 = dma.done.wait (%p334_p2), %s232_s4, 32  }
  0x4c   : > { %471 = vsyncadd (%p334_p2), %s232_s4, 4294967264  ;;  %s20_s16 = sadd.s32 1, %s494_s16   ;;  %s668_s12 = smov %s478_s13 }
  0x4d   : > { %p17_p3 = scmp.ge.s32.totalorder %s20_s16, 4   ;;  %s669_s13 = smov %s482_s14 }
  0x4e   : > { %s670_s14 = smov %s574_s25  ;;  %s671_s0 = smov %s490_s15 }
  0x4f   : > { %s672_s15 = smov %s674_s19  ;;  %19 = sbr.rel (!%p17_p3) target bundleno = 6 (0x6), region = 76 }
  0x54   :  { %237 = vsyncpa [#allocation5], 1 }
  0x55   :  { %239 = vsyncpa [#allocation5 + $0x1], 1 }
  0x56   :  { %240 = vsyncpa [#allocation6], 1 }
  0x57   :  { %242 = vsyncpa [#allocation6 + $0x1], 1 }

</bundles_post_ra>
